<compile_context>
chip_gen: v5e
topology: v5e:2x2
jax: 0.10.0
libtpu: 0.0.40
codegen_flags: <defaults>
</compile_context>

<pallas_src>
import functools
import math

import jax
import jax.numpy as jnp
from jax import lax
from jax.experimental import pallas as pl
from jax.experimental.pallas import tpu as pltpu


def _round_up(x, m):
    return ((x + m - 1) // m) * m


def _nt_xent_kernel(zr_ref, zp_ref, zc_ref, loss_ref, l_sc, *,
                    batch, batch_pad, block_m, shift, num_padded_cols):
    """One (row-block i, column-block j) step of the tiled NT-Xent loss.

    zr_ref:   (TM, Dp) bf16  pre-normalized rows (each already scaled by rsqrt(T))
    zp_ref:   (TM, Dp) bf16  positive-partner rows (other half, same in-block order)
    zc_ref:   (TN, Dp) bf16  rows providing the columns of this similarity tile
    loss_ref: (TM, 128) f32  per-row loss, broadcast over lanes (written at last j)
    l_sc:     (TM, 1)  f32   running softmax-denominator sum (fixed shift c = 1/T)
    """
    i = pl.program_id(0)
    j = pl.program_id(1)
    nj = pl.num_programs(1)

    c = jnp.float32(shift)  # = 1/temperature; cos <= 1 so s <= c (no running max needed)

    @pl.when(j == 0)
    def _():
        l_sc[...] = jnp.zeros_like(l_sc)

    # sim/T tile on the MXU: bf16 operands, f32 accumulation, contract last dims.
    s = lax.dot_general(
        zr_ref[...], zc_ref[...],
        dimension_numbers=(((1,), (1,)), ((), ())),
        preferred_element_type=jnp.float32)                 # (TM, TN)

    # Fixed-shift denominator accumulation: no per-tile masking, no rescaling.
    # TODO(synk): on v6e/v7x the exp could run in bf16 (exp((s - c).astype(bf16))) for
    # ~2x EUP throughput; kept f32 so the identical kernel also lowers on v5e.
    l_sc[...] += jnp.sum(jnp.exp(s - c), axis=-1, keepdims=True)

    @pl.when(j == nj - 1)
    def _():
        zr = zr_ref[...].astype(jnp.float32)
        zp = zp_ref[...].astype(jnp.float32)
        # Positive pair and diagonal terms from the *same* bf16-rounded operands the
        # MXU consumed, so numerator and denominator stay consistent.
        pos = jnp.sum(zr * zp, axis=-1, keepdims=True)      # sim[r, partner(r)] / T
        diag = jnp.sum(zr * zr, axis=-1, keepdims=True)     # sim[r, r] / T
        # Analytic corrections instead of per-tile masks:
        #   - remove the diagonal contribution exp(diag - c)
        #   - padded z rows are exact zero vectors => each padded column contributed
        #     exactly exp(0 - c); remove all of them at once.
        l = (l_sc[...] - jnp.exp(diag - c)
             - jnp.float32(num_padded_cols) * jnp.exp(-c))
        lse = c + jnp.log(jnp.maximum(l, jnp.float32(1e-30)))
        row = i * block_m + lax.broadcasted_iota(jnp.int32, (block_m, 1), 0)
        row_valid = (row < batch) | ((row >= batch_pad) & (row < batch_pad + batch))
        row_loss = jnp.where(row_valid, lse - pos, jnp.float32(0.0))   # (TM, 1)
        # Lane-broadcast so the store is full unmasked vregs (no vst.msk).
        loss_ref[...] = jnp.broadcast_to(row_loss, (block_m, 128))


def nt_xent_loss(z_i, z_j, temperature, eps=1e-8, block_rows=256, block_cols=1024):
    """NT-Xent loss matching the PyTorch NT_Xent.forward semantics.

    block_rows: row tile (use multiples of 128 on v5e / 256 on v6e-v7x for production
                batches; it is clamped for tiny demo batches).
    block_cols: target column tile; when the whole padded column operand (+ sim tile)
                is small it is instead kept VMEM-resident (one column step per row block).
    """
    b, d = z_i.shape
    assert z_j.shape == (b, d)

    tm = _round_up(min(int(block_rows), _round_up(b, 8)), 8)    # row tile
    b_pad = _round_up(b, tm)                                    # padded half size
    d_pad = _round_up(d, 128)                                   # lane-dense feature dim
    n_pad = 2 * b_pad

    # Normalize + fold rsqrt(T) into each operand ONCE (outside the grid), then bf16.
    # Zero padding keeps padded rows as exact zero vectors (exploited analytically in-kernel).
    inv_sqrt_t = 1.0 / math.sqrt(float(temperature))

    def _prep(x):
        x = x.astype(jnp.float32)
        nrm = jnp.sqrt(jnp.sum(x * x, axis=-1, keepdims=True))
        x = x / jnp.maximum(nrm, jnp.float32(eps)) * jnp.float32(inv_sqrt_t)
        x = jnp.pad(x, ((0, b_pad - b), (0, d_pad - d)))
        return x.astype(jnp.bfloat16)

    z = jnp.concatenate([_prep(z_i), _prep(z_j)], axis=0)       # (n_pad, d_pad) bf16

    # Column tile: keep the whole column operand VMEM-resident when small, otherwise
    # use a large column tile (multiple of tm) that divides n_pad.
    resident_bytes = n_pad * d_pad * 2 + tm * n_pad * 4         # bf16 cols + f32 sim tile
    if n_pad <= block_cols and resident_bytes <= 4 * 1024 * 1024:
        tn = n_pad
    else:
        k = n_pad // tm
        f = max(1, min(max(int(block_cols), tm) // tm, k))
        while k % f:
            f -= 1
        tn = tm * f

    grid_m = n_pad // tm
    grid_n = n_pad // tn
    half = grid_m // 2

    kernel = functools.partial(
        _nt_xent_kernel,
        batch=b, batch_pad=b_pad, block_m=tm,
        shift=float(1.0 / float(temperature)),
        num_padded_cols=2 * (b_pad - b))

    def partner_map(i, j):
        # Row block i of the first half pairs with block i + half of the second half
        # (and vice versa); independent of j, so it is not re-DMA'd per column step.
        return (jnp.where(i < half, i + half, i - half), 0)

    # Rough VMEM budget (double-buffered inputs + sim/exp temporaries), capped so the
    # limit is valid on v7x (64 MiB per TensorCore) as well as v5e/v6e (128 MiB).
    vmem_est = (4 * tm * d_pad * 2            # zr + zp blocks (bf16, double-buffered)
                + 2 * tn * d_pad * 2          # zc block (bf16, double-buffered)
                + 4 * tm * tn * 4             # sim tile + exp temporaries
                + 4 * tm * 128 * 4)           # loss block + scratch
    vmem_limit = int(min(64 * 1024 * 1024, max(32 * 1024 * 1024, 2 * vmem_est)))

    per_row = pl.pallas_call(
        kernel,
        out_shape=jax.ShapeDtypeStruct((n_pad, 128), jnp.float32),
        grid_spec=pltpu.PrefetchScalarGridSpec(
            num_scalar_prefetch=0,
            grid=(grid_m, grid_n),
            in_specs=[
                pl.BlockSpec((tm, d_pad), lambda i, j: (i, 0)),   # row block
                pl.BlockSpec((tm, d_pad), partner_map),           # positive-partner block
                pl.BlockSpec((tn, d_pad), lambda i, j: (j, 0)),   # column block
            ],
            out_specs=pl.BlockSpec((tm, 128), lambda i, j: (i, 0)),
            scratch_shapes=[pltpu.VMEM((tm, 1), jnp.float32)],    # running exp-sum
        ),
        compiler_params=pltpu.CompilerParams(
            dimension_semantics=("parallel", "arbitrary"),
            vmem_limit_bytes=vmem_limit),
    )(z, z, z)

    # Tiny O(N) final reduction in XLA so the row-block grid axis can stay "parallel".
    return jnp.sum(per_row[:, 0]) / jnp.float32(2 * b)


def _nt_xent_reference(z_i, z_j, temperature, eps=1e-8):
    """Pure-JAX reference mirroring the PyTorch module's forward."""
    b = z_i.shape[0]
    n = 2 * b
    z = jnp.concatenate([z_i, z_j], axis=0).astype(jnp.float32)
    zn = z / jnp.maximum(jnp.linalg.norm(z, axis=-1, keepdims=True), eps)
    sim = (zn @ zn.T) / temperature
    idx = jnp.arange(n)
    pos_col = jnp.where(idx < b, idx + b, idx - b)
    pos = sim[idx, pos_col]
    sim_no_diag = jnp.where(idx[:, None] == idx[None, :], -jnp.inf, sim)
    lse = jax.scipy.special.logsumexp(sim_no_diag, axis=-1)
    return jnp.sum(lse - pos) / n


if __name__ == "__main__":
    temperature = 0.5
    key = jax.random.PRNGKey(0)
    k1, k2, k3, k4, k5, k6 = jax.random.split(key, 6)

    # Config 1: small tiles, multiple column steps -> exercises the fixed-shift
    # accumulation across the "arbitrary" column axis.
    b1, d1 = 16, 32
    zi1 = jax.random.normal(k1, (b1, d1), dtype=jnp.float32)
    zj1 = jax.random.normal(k2, (b1, d1), dtype=jnp.float32)
    loss1 = nt_xent_loss(zi1, zj1, temperature, block_rows=8, block_cols=16)
    jax.block_until_ready(loss1)
    ref1 = _nt_xent_reference(zi1, zj1, temperature)
    assert jnp.allclose(loss1, ref1, rtol=2e-2, atol=2e-2), (loss1, ref1)

    # Config 2: batch not a multiple of the tile -> exercises the analytic
    # padded-column correction and the VMEM-resident column path (grid_n == 1).
    b2, d2 = 10, 48
    zi2 = jax.random.normal(k3, (b2, d2), dtype=jnp.float32)
    zj2 = jax.random.normal(k4, (b2, d2), dtype=jnp.float32)
    loss2 = nt_xent_loss(zi2, zj2, temperature)
    jax.block_until_ready(loss2)
    ref2 = _nt_xent_reference(zi2, zj2, temperature)
    assert jnp.allclose(loss2, ref2, rtol=2e-2, atol=2e-2), (loss2, ref2)

    # Config 3: feature dim > 128 and padding + multiple column steps together.
    b3, d3 = 24, 200
    zi3 = jax.random.normal(k5, (b3, d3), dtype=jnp.float32)
    zj3 = jax.random.normal(k6, (b3, d3), dtype=jnp.float32)
    loss3 = nt_xent_loss(zi3, zj3, temperature, block_rows=16, block_cols=32)
    jax.block_until_ready(loss3)
    ref3 = _nt_xent_reference(zi3, zj3, temperature)
    assert jnp.allclose(loss3, ref3, rtol=2e-2, atol=2e-2), (loss3, ref3)

    print("KERNEL_OK")
</pallas_src>

<mosaic_0001>
module attributes {stable_mosaic.version = 11 : i64} {
  func.func @_nt_xent_kernel(%arg0: i32, %arg1: i32, %arg2: memref<8x128xbf16, #tpu.memory_space<vmem>>, %arg3: memref<8x128xbf16, #tpu.memory_space<vmem>>, %arg4: memref<16x128xbf16, #tpu.memory_space<vmem>>, %arg5: memref<8x128xf32, #tpu.memory_space<vmem>>, %arg6: memref<8x1xf32, #tpu.memory_space<vmem>>) attributes {dimension_semantics = [#tpu.dimension_semantics<parallel>, #tpu.dimension_semantics<arbitrary>], iteration_bounds = array<i64: 4, 2>, scalar_prefetch = 0 : i64, scratch_operands = 1 : i64, tpu.core_type = #tpu.core_type<tc>, window_params = [{transform_indices = @transform_0, window_bounds = array<i64: 8, 128>}, {transform_indices = @transform_1, window_bounds = array<i64: 8, 128>}, {transform_indices = @transform_2, window_bounds = array<i64: 16, 128>}, {transform_indices = @transform_3, window_bounds = array<i64: 8, 128>}]} {
    %c0_i32 = arith.constant 0 : i32
    %0 = arith.cmpi eq, %arg1, %c0_i32 : i32
    %1 = arith.extui %0 : i1 to i32
    %c0_i32_0 = arith.constant 0 : i32
    %2 = arith.cmpi ne, %1, %c0_i32_0 : i32
    scf.if %2 {
      %cst_12 = arith.constant 0.000000e+00 : f32
      %17 = vector.broadcast %cst_12 : f32 to vector<8x1xf32>
      %c0_13 = arith.constant 0 : index
      %c0_14 = arith.constant 0 : index
      %18 = vector.load %arg6[%c0_13, %c0_14] : memref<8x1xf32, #tpu.memory_space<vmem>>, vector<8x1xf32>
      tpu.vector_store %arg6[%c0_13, %c0_14], %17 {strides = array<i32>} : memref<8x1xf32, #tpu.memory_space<vmem>>, vector<8x1xf32>,
    } else {
    }
    %c0 = arith.constant 0 : index
    %c0_1 = arith.constant 0 : index
    %3 = vector.load %arg2[%c0, %c0_1] : memref<8x128xbf16, #tpu.memory_space<vmem>>, vector<8x128xbf16>
    %c0_2 = arith.constant 0 : index
    %c0_3 = arith.constant 0 : index
    %4 = vector.load %arg4[%c0_2, %c0_3] : memref<16x128xbf16, #tpu.memory_space<vmem>>, vector<16x128xbf16>
    %cst = arith.constant dense<0.000000e+00> : vector<8x16xf32>
    %5 = tpu.matmul %3, %4, %cst {dimension_numbers = #tpu.dot_dimension_numbers<[1], [1], [0], [0], [0, 0, 1, 0], [], []>} : vector<8x128xbf16>, vector<16x128xbf16>, vector<8x16xf32> -> vector<8x16xf32>
    %c0_4 = arith.constant 0 : index
    %c0_5 = arith.constant 0 : index
    %6 = vector.load %arg6[%c0_4, %c0_5] : memref<8x1xf32, #tpu.memory_space<vmem>>, vector<8x1xf32>
    %cst_6 = arith.constant 2.000000e+00 : f32
    %7 = vector.broadcast %cst_6 : f32 to vector<8x16xf32>
    %8 = arith.subf %5, %7 : vector<8x16xf32>
    %9 = math.exp %8 : vector<8x16xf32>
    %cst_7 = arith.constant dense<0.000000e+00> : vector<8xf32>
    %10 = vector.multi_reduction <add>, %9, %cst_7 [1] : vector<8x16xf32> to vector<8xf32>
    %11 = vector.shape_cast %10 : vector<8xf32> to vector<8x1xf32>
    %12 = arith.addf %6, %11 : vector<8x1xf32>
    %c0_8 = arith.constant 0 : index
    %c0_9 = arith.constant 0 : index
    %13 = vector.load %arg6[%c0_8, %c0_9] : memref<8x1xf32, #tpu.memory_space<vmem>>, vector<8x1xf32>
    tpu.vector_store %arg6[%c0_8, %c0_9], %12 {strides = array<i32>} : memref<8x1xf32, #tpu.memory_space<vmem>>, vector<8x1xf32>,
    %c1_i32 = arith.constant 1 : i32
    %14 = arith.cmpi eq, %arg1, %c1_i32 : i32
    %15 = arith.extui %14 : i1 to i32
    %cst_10 = arith.constant 2.000000e+00 : f32
    %c0_i32_11 = arith.constant 0 : i32
    %16 = arith.cmpi ne, %15, %c0_i32_11 : i32
    scf.if %16 {
      %c0_12 = arith.constant 0 : index
      %c0_13 = arith.constant 0 : index
      %17 = vector.load %arg2[%c0_12, %c0_13] : memref<8x128xbf16, #tpu.memory_space<vmem>>, vector<8x128xbf16>
      %18 = arith.extf %17 : vector<8x128xbf16> to vector<8x128xf32>
      %c0_14 = arith.constant 0 : index
      %c0_15 = arith.constant 0 : index
      %19 = vector.load %arg3[%c0_14, %c0_15] : memref<8x128xbf16, #tpu.memory_space<vmem>>, vector<8x128xbf16>
      %20 = arith.extf %19 : vector<8x128xbf16> to vector<8x128xf32>
      %21 = arith.mulf %18, %20 : vector<8x128xf32>
      %cst_16 = arith.constant dense<0.000000e+00> : vector<8xf32>
      %22 = vector.multi_reduction <add>, %21, %cst_16 [1] : vector<8x128xf32> to vector<8xf32>
      %23 = vector.shape_cast %22 : vector<8xf32> to vector<8x1xf32>
      %24 = arith.mulf %18, %18 : vector<8x128xf32>
      %cst_17 = arith.constant dense<0.000000e+00> : vector<8xf32>
      %25 = vector.multi_reduction <add>, %24, %cst_17 [1] : vector<8x128xf32> to vector<8xf32>
      %26 = vector.shape_cast %25 : vector<8xf32> to vector<8x1xf32>
      %c0_18 = arith.constant 0 : index
      %c0_19 = arith.constant 0 : index
      %27 = vector.load %arg6[%c0_18, %c0_19] : memref<8x1xf32, #tpu.memory_space<vmem>>, vector<8x1xf32>
      %28 = vector.broadcast %cst_10 : f32 to vector<8x1xf32>
      %29 = arith.subf %26, %28 : vector<8x1xf32>
      %30 = math.exp %29 : vector<8x1xf32>
      %31 = arith.subf %27, %30 : vector<8x1xf32>
      %cst_20 = arith.constant 0.000000e+00 : f32
      %32 = arith.subf %cst_20, %cst_10 : f32
      %33 = math.exp %32 : f32
      %cst_21 = arith.constant 0.000000e+00 : f32
      %34 = arith.mulf %cst_21, %33 : f32
      %35 = vector.broadcast %34 : f32 to vector<8x1xf32>
      %36 = arith.subf %31, %35 : vector<8x1xf32>
      %cst_22 = arith.constant 1.000000e-30 : f32
      %37 = vector.broadcast %cst_22 : f32 to vector<8x1xf32>
      %38 = arith.maximumf %36, %37 : vector<8x1xf32>
      %39 = math.log %38 : vector<8x1xf32>
      %40 = vector.broadcast %cst_10 : f32 to vector<8x1xf32>
      %41 = arith.addf %40, %39 : vector<8x1xf32>
      %c8_i32 = arith.constant 8 : i32
      %42 = arith.muli %arg0, %c8_i32 : i32
      %43 = tpu.iota {dimensions = array<i32: 0>} : vector<8x1xi32>
      %44 = vector.broadcast %42 : i32 to vector<8x1xi32>
      %45 = arith.addi %44, %43 : vector<8x1xi32>
      %c16_i32 = arith.constant 16 : i32
      %46 = vector.broadcast %c16_i32 : i32 to vector<8x1xi32>
      %47 = arith.cmpi slt, %45, %46 : vector<8x1xi32>
      %c16_i32_23 = arith.constant 16 : i32
      %48 = vector.broadcast %c16_i32_23 : i32 to vector<8x1xi32>
      %49 = arith.cmpi sge, %45, %48 : vector<8x1xi32>
      %c32_i32 = arith.constant 32 : i32
      %50 = vector.broadcast %c32_i32 : i32 to vector<8x1xi32>
      %51 = arith.cmpi slt, %45, %50 : vector<8x1xi32>
      %52 = arith.andi %49, %51 : vector<8x1xi1>
      %53 = arith.ori %47, %52 : vector<8x1xi1>
      %54 = arith.subf %41, %23 : vector<8x1xf32>
      %cst_24 = arith.constant 0.000000e+00 : f32
      %55 = vector.broadcast %cst_24 : f32 to vector<8x1xf32>
      %56 = arith.select %53, %54, %55 : vector<8x1xi1>, vector<8x1xf32>
      %57 = vector.shape_cast %56 : vector<8x1xf32> to vector<8x1xf32>
      %58 = vector.broadcast %57 : vector<8x1xf32> to vector<8x128xf32>
      %c0_25 = arith.constant 0 : index
      %c0_26 = arith.constant 0 : index
      %59 = vector.load %arg5[%c0_25, %c0_26] : memref<8x128xf32, #tpu.memory_space<vmem>>, vector<8x128xf32>
      tpu.vector_store %arg5[%c0_25, %c0_26], %58 {strides = array<i32>} : memref<8x128xf32, #tpu.memory_space<vmem>>, vector<8x128xf32>,
    } else {
    }
    return
  }
  func.func @transform_0(%arg0: i32, %arg1: i32) -> (i32, i32) {
    %c0_i32 = arith.constant 0 : i32
    %c0_i32_0 = arith.constant 0 : i32
    return %arg0, %c0_i32 : i32, i32
  }
  func.func @transform_1(%arg0: i32, %arg1: i32) -> (i32, i32) {
    %c2_i32 = arith.constant 2 : i32
    %0 = arith.cmpi slt, %arg0, %c2_i32 : i32
    %c2_i32_0 = arith.constant 2 : i32
    %1 = arith.addi %arg0, %c2_i32_0 : i32
    %c2_i32_1 = arith.constant 2 : i32
    %2 = arith.subi %arg0, %c2_i32_1 : i32
    %3 = arith.select %0, %1, %2 : i32
    %c0_i32 = arith.constant 0 : i32
    %c0_i32_2 = arith.constant 0 : i32
    return %3, %c0_i32 : i32, i32
  }
  func.func @transform_2(%arg0: i32, %arg1: i32) -> (i32, i32) {
    %c0_i32 = arith.constant 0 : i32
    %c0_i32_0 = arith.constant 0 : i32
    return %arg1, %c0_i32 : i32, i32
  }
  func.func @transform_3(%arg0: i32, %arg1: i32) -> (i32, i32) {
    %c0_i32 = arith.constant 0 : i32
    %c0_i32_0 = arith.constant 0 : i32
    return %arg0, %c0_i32 : i32, i32
  }
}

</mosaic_0001>

<bundles_post_ra>
// kernel: tpu_custom_call.1
= control target key start
LH: loop header
LB: loop body
LE: loop exit
PB: predicated region body
PF: predicated region fallthrough
CT: control target
= control target key end

     0   :  { %s1298_s0 = inlined_call_operand.hbm [shape: bf16[32,128], index: 0, kind: input, shape index: {}]   ;;  %s1299_s1 = inlined_call_operand.hbm [shape: bf16[32,128], index: 1, kind: input, shape index: {}]   ;;  %s1300_s2 = inlined_call_operand.hbm [shape: bf16[32,128], index: 2, kind: input, shape index: {}]   ;;  %s1301_s3 = inlined_call_operand.hbm [shape: f32[32,128], index: 3, kind: output, shape index: {}]  }
   0x1   :  { %1315 = sst [smem:[#allocation27_spill]] %s1299_s1 }
   0x2   :  { %1316 = sst [smem:[#allocation28_spill]] %s1301_s3 }
   0x3   :  { %8 = vsyncpa [#allocation4], 0 }
   0x4   :  { %10 = vsyncpa [#allocation4 + $0x1], 0 }
   0x5   :  { %11 = vsyncpa [#allocation7], 0 }
   0x6   :  { %13 = vsyncpa [#allocation7 + $0x1], 0 }
   0x7   :  { %14 = vsyncpa [#allocation5], 0 }
   0x8   :  { %16 = vsyncpa [#allocation5 + $0x1], 0  ;;  %s968_s12 = smov 0   ;;  %s970_s13 = smov 0  }
   0x9   :  { %s972_s14 = smov 0   ;;  %s974_s15 = smov 0  }
   0xa   :  { %s976_s16 = smov 0   ;;  %s978_s17 = smov 0  }
   0xb   :  { %s980_s18 = smov 0   ;;  %s982_s19 = smov 0  }
   0xc   :  { %s984_s20 = smov 0   ;;  %s986_s21 = smov 0  }
   0xd   :  { %s988_s22 = smov 0   ;;  %s990_s23 = smov 0  }
   0xe   :  { %s992_s24 = smov 0   ;;  %s994_s25 = smov 0  }
   0xf LB: > { %1317 = sst [smem:[#allocation14_spill]] %s910_s17  ;;  %s1039_s26 = sadd.s32 4294967295, %s942_s25   ;;  %s942_s25 = sphi %s994_s25, %s22_s25   ;;  %s938_s24 = sphi %s992_s24, %s1362_s24   ;;  %s934_s23 = sphi %s990_s23, %s1373_s23   ;;  %s930_s22 = sphi %s988_s22, %s1372_s22   ;;  %s926_s21 = sphi %s986_s21, %s1371_s21   ;;  %s922_s20 = sphi %s984_s20, %s1359_s20   ;;  %s918_s19 = sphi %s982_s19, %s1370_s19   ;;  %s914_s18 = sphi %s980_s18, %s1369_s18   ;;  %s910_s17 = sphi %s978_s17, %s1357_s17   ;;  %s906_s16 = sphi %s976_s16, %s1368_s16   ;;  %s902_s15 = sphi %s974_s15, %s1367_s15   ;;  %s898_s14 = sphi %s972_s14, %s1366_s14   ;;  %s894_s13 = sphi %s970_s13, %s1365_s13   ;;  %s890_s12 = sphi %s968_s12, %s1364_s12  }
  0x10   : > { %1318 = sst [smem:[#allocation15_spill]] %s914_s18  ;;  %s31_s27 = sadd.s32 1, %s934_s23 }
  0x11   : > { %1319 = sst [smem:[#allocation16_spill]] %s922_s20  ;;  %p32_p0 = scmp.ge.s32.totalorder %s31_s27, 2 }
  0x12   : > { %1320 = sst [smem:[#allocation17_spill]] %s926_s21  ;;  %s34_s28 = sadd.s32 1, %s938_s24 }
  0x13   : > { %1321 = sst [smem:[#allocation18_spill]] %s930_s22  ;;  %p1306_p1 = scmp.eq.s32.totalorder %s942_s25, 0 }
  0x14   : > { %1322 = sst [smem:[#allocation19_spill]] %s938_s24  ;;  %p1305_p2 = scmp.eq.s32.totalorder %s1039_s26, 0 }
  0x15   : > { %s1375_s27 = smov (%p32_p0, %s31_s27), 0  ;;  %s1377_s28 = smov (!%p32_p0, %s34_s28), %s938_s24 }
  0x16   : > { %1323 = sst [smem:[#allocation20_spill]] %s1375_s27  ;;  %p64_p3 = scmp.lt.s32.totalorder %s938_s24, 2 }
  0x17   : > { %s65_s29 = sadd.s32 2, %s938_s24  ;;  %p36_p4 = scmp.ge.s32.totalorder %s1377_s28, 4 }
  0x18   : > { %s518_s30 = sadd.s32 4294967294, %s938_s24  ;;  %s75_s4 = sadd.s32 1, %s910_s17 }
  0x19   : > { %s1379_s29 = smov (!%p64_p3, %s65_s29), %s518_s30  ;;  %s1381_s28 = smov (%p36_p4, %s1377_s28), 0 }
  0x1a   : > { %1324 = sst [smem:[#allocation21_spill]] %s1381_s28  ;;  %p82_p5 = scmp.ne.s32.totalorder %s910_s17, %s906_s16 }
  0x1b   : > { %p68_p6 = scmp.lt.s32.totalorder %s1381_s28, 2  ;;  %s69_s5 = sadd.s32 2, %s1381_s28 }
  0x1c   : > { %s519_s6 = sadd.s32 4294967294, %s1381_s28  ;;  %p1061_p7 = por %p82_p5, %p1306_p1 }
  0x1d   : > { %s1383_s5 = smov (!%p68_p6, %s69_s5), %s519_s6  ;;  %p88_p8 = scmp.ne.s32.totalorder %s906_s16, %s902_s15 }
  0x1e   : > { %s98_s8 = ssub.s32 %s934_s23, %s1375_s27  ;;  %s72_s9 = ssub.s32 %s1379_s29, %s1383_s5 }
  0x1f   : > { %p99_p9 = scmp.eq.s32.totalorder %s98_s8, 0  ;;  %p73_p10 = scmp.eq.s32.totalorder %s72_s9, 0 }
  0x20   : > { %p1071_p11 = por %p88_p8, %p1305_p2  ;;  %s101_s11 = sadd.s32 1, %s898_s14 }
  0x21   : > { %p108_p12 = scmp.ne.s32.totalorder %s898_s14, %s894_s13  ;;  %p114_p0 = scmp.ne.s32.totalorder %s894_s13, %s890_s12 }
  0x22   : > { %s1079_s30 = scalar_select %p73_p10, %s910_s17, %s75_s4  }
  0x23   : > { %s1082_s3 = scalar_select %p99_p9, %s898_s14, %s101_s11  }
  0x24   : > { %1327 = sst [smem:[#allocation22_spill]] %s1079_s30  ;;  %p1086_p13 = por %p108_p12, %p1306_p1 }
  0x25   : > { %1328 = sst [smem:[#allocation23_spill]] %s1082_s3  ;;  %p1304_p3 = scmp.lt.s32.totalorder %s942_s25, 8 }
  0x26   : > { %p1095_p4 = por %p114_p0, %p1305_p2  ;;  %s183_s4 = sand.u32 1, %s942_s25  }
  0x27   : > { %s185_s6 = sand.u32 1, %s910_s17   ;;  %s526_s9 = sshll.u32 %s1379_s29, 2 }
  0x28   : > { %s524_s8 = sshll.u32 %s185_s6, 2  ;;  %s1331_s1 = sld [smem:[#allocation27_spill]] }
  0x29   : > { %s187_s22 = scalar_lea.vmem [#allocation6], %s524_s8  ;;  %p1108_p5 = pnand %p1304_p3, %p1061_p7 }
  0x2a   : > { %s199_s21 = sshll.u32 %s187_s22, 4  ;;  %p1116_p6 = pnand %p1304_p3, %p1086_p13  ;;  %s200_s21 = int_to_ptr.vmem [resolvable:$true] %s199_s21 }
  0x2b   : > { %p530_p8 = scmp.ge.s32.totalorder %s942_s25, 1  ;;  %p226_p9 = scmp.lt.s32.totalorder %s942_s25, 9 }
  0x2c   : > { %s1122_s27 = scalar_lea.sflag [#allocation7], %s183_s4  ;;  %p702_p7 = pneg %p1108_p5 }
  0x2e   : > { %s195_s30 = scalar_lea.hbm %s1331_s1, %s526_s9  ;;  %s705_s6 = scalar_lea.hbm %s1331_s1, 16 }
  0x2f   : > { %s197_s3 = sshll.u32 %s195_s30, 4  ;;  %s198_s3 = int_to_ptr.hbm [resolvable:$true] %s197_s3 }
  0x30   : > { %s698_s22 = sshra.s32 %s198_s3, 4  ;;  %s699_s22 = int_to_ptr.hbm [resolvable:$true] %s698_s22 }
  0x31   : > { %s700_s30 = scalar_lea.hbm %s699_s22, 4  ;;  %p706_p13 = scmp.lt.s32.totalorder %s699_s22, %s1331_s1 }
  0x32   : > { %p701_p10 = scmp.ne.s32.totalorder %s699_s22, %s700_s30  ;;  %p707_p3 = scmp.lt.s32.totalorder %s705_s6, %s700_s30 }
  0x34   : > { %p703_p12 = pnand %p702_p7, %p701_p10  ;;  %p708_p2 = por %p707_p3, %p706_p13 }
  0x36   : > { %p704_p0 = pneg %p703_p12 }
  0x38   : > { %p709_p1 = pnand %p708_p2, %p704_p0 }
  0x3a   : > { %712 = shalt.err (!%p709_p1)
}
  0x3b   : > { %564 = dma.hbm_to_vmem [thread:$0]  (!%p1108_p5), %s198_s3, 64, %s200_s21, %s1122_s27  }
  0x3c   : > { %p1139_p1 = pnand %p530_p8, %p226_p9  ;;  %s517_s11 = sadd.s32 4294967294, %s942_s25  }
  0x3d   : > { %s38_s12 = ssub.s32 %s938_s24, %s1381_s28  ;;  %s41_s22 = sadd.s32 1, %s922_s20 }
  0x3e   : > { %p39_p2 = scmp.eq.s32.totalorder %s38_s12, 0  ;;  %p48_p3 = scmp.ne.s32.totalorder %s922_s20, %s918_s19 }
  0x3f   : > { %p54_p10 = scmp.ne.s32.totalorder %s918_s19, %s914_s18  ;;  %p138_p7 = scmp.eq.s32.totalorder %s1039_s26, 7 }
  0x40   : > { %s1153_s30 = scalar_select %p39_p2, %s922_s20, %s41_s22  }
  0x41   : > { %p1336_p12 = scmp.eq.s32.totalorder %s942_s25, 0  ;;  %p1338_p5 = scmp.eq.s32.totalorder %s1039_s26, 0 }
  0x42   : > { %1335 = sst [smem:[#allocation24_spill]] %s1153_s30  ;;  %p1167_p9 = por %p138_p7, %p48_p3 }
  0x43   : > { %p1157_p0 = por %p1336_p12, %p48_p3  ;;  %p1163_p8 = por %p1338_p5, %p54_p10 }
  0x44   : > { %s1340_s7 = scalar_select %p1167_p9, 1, 0 }
  0x45   : > { %p144_p13 = scmp.eq.s32.totalorder %s517_s11, 7  ;;  %s164_s15 = sand.u32 1, %s922_s20  }
  0x46   : > { %1341 = sst [smem:[#allocation25_spill]] %s1340_s7  ;;  %s523_s6 = sshll.u32 %s938_s24, 2 }
  0x47   : > { %p1173_p2 = por %p144_p13, %p54_p10  ;;  %s522_s9 = sshll.u32 %s164_s15, 2 }
  0x48   : > { %s172_s1 = scalar_lea.hbm %s1298_s0, %s523_s6  ;;  %s168_s30 = scalar_lea.vmem [#allocation3], %s522_s9 }
  0x49   : > { %s1342_s8 = scalar_select %p1173_p2, 1, 0 }
  0x4a   : > { %s174_s28 = sshll.u32 %s172_s1, 4  ;;  %s176_s17 = sshll.u32 %s168_s30, 4  ;;  %s175_s28 = int_to_ptr.hbm [resolvable:$true] %s174_s28  ;;  %s177_s17 = int_to_ptr.vmem [resolvable:$true] %s176_s17 }
  0x4b   : > { %1343 = sst [smem:[#allocation26_spill]] %s1342_s8  ;;  %p1344_p3 = scmp.lt.s32.totalorder %s942_s25, 8 }
  0x4c   : > { %s208_s11 = sand.u32 1, %s898_s14   ;;  %s548_s24 = sshll.u32 %s934_s23, 3 }
  0x4d   : > { %p559_p7 = pnand %p1344_p3, %p1157_p0  ;;  %s527_s20 = sshll.u32 %s208_s11, 3 }
  0x4e   : > { %s165_s18 = scalar_lea.sflag [#allocation4], %s164_s15  ;;  %s215_s12 = scalar_lea.hbm %s1300_s2, %s548_s24 }
  0x4f   : > { %561 = dma.hbm_to_vmem [thread:$0]  (!%p559_p7), %s175_s28, 64, %s177_s17, %s165_s18  }
  0x50   : > { %s216_s6 = sshll.u32 %s215_s12, 4  ;;  %s210_s1 = scalar_lea.vmem [#allocation8], %s527_s20  ;;  %s217_s6 = int_to_ptr.hbm [resolvable:$true] %s216_s6 }
  0x51   : > { %s218_s22 = sshll.u32 %s210_s1, 4  ;;  %s944_s30 = smov 64   ;;  %s219_s22 = int_to_ptr.vmem [resolvable:$true] %s218_s22 }
  0x52   : > { %s945_s9 = smov 4   ;;  %230 = sbr.rel (%p1139_p1) target bundleno = 663 (0x297), region = 32 }
  0x53   : > { %567 = dma.hbm_to_vmem [thread:$0]  (!%p1116_p6), %s217_s6, 128, %s219_s22, %s1122_s27, %s944_s30, %s944_s30, %s945_s9  }
  0x54   : > { %s1195_s3 = sand.u32 (!%p1139_p1), 1, %s918_s19  }
  0x55   : > { %s531_s17 = sshll.u32 (!%p1139_p1), %s1195_s3, 2  ;;  %s233_s18 = scalar_lea.sflag (!%p1139_p1), [#allocation4], %s1195_s3 }
  0x56   : > { %s1199_s24 = scalar_lea.vmem (!%p1139_p1), [#allocation3], %s531_s17 }
  0x57   : > { %873 = dma.done.wait (%p1163_p8), %s233_s18, 64  }
  0x58   : > { %875 = vsyncadd (%p1163_p8), %s233_s18, 4294967232  ;;  %s242_s20 = sand.u32 1, %s1039_s26   ;;  %s244_s28 = sand.u32 1, %s906_s16  }
  0x59   : > { %s1207_s29 = sshll.u32 %s244_s28, 2  ;;  %s243_s27 = scalar_lea.sflag [#allocation7], %s242_s20 }
  0x5a   : > { %s246_s4 = scalar_lea.vmem [#allocation6], %s1207_s29 }
  0x5b   : > { %877 = dma.done.wait (%p1071_p11), %s243_s27, 64  }
  0x5c   : > { %879 = vsyncadd (%p1071_p11), %s243_s27, 4294967232  ;;  %s254_s7 = sand.u32 1, %s894_s13  }
  0x5d   : > { %s533_s21 = sshll.u32 %s254_s7, 3 }
  0x5e   : > { %s256_s15 = scalar_lea.vmem [#allocation8], %s533_s21 }
  0x5f   : > { %881 = dma.done.wait (%p1095_p4), %s243_s27, 128  }
  0x60   : > { %883 = vsyncadd (%p1095_p4), %s243_s27, 4294967168  ;;  %s534_s26 = sshll.u32 %s1195_s3, 3  ;;  %s1345_s11 = sld [smem:[#allocation17_spill]] }
  0x61   : > { %s1220_s8 = scalar_lea.vmem [#allocation9], %s534_s26 }
  0x66   : > { %p535_p6 = scmp.ne.s32.totalorder %s1345_s11, 0 }
  0x68   : > { %299 = sbr.rel (%p535_p6) target bundleno = 111 (0x6f), region = 48 }
  0x6d   : > { %vm300_vm0 = vcmask 7168   ;;  %v946_v0 = vmov 0.0  }
  0x6e   : > { %301 = vst.msk [vmem:[#allocation2] sm:$0xff] %vm300_vm0, %v946_v0 }
  0x6f PF: > { %v549_v1 = vld [vmem:[%s256_s15] sm:$0xff]  ;;  %v302_v2 = vld [vmem:[%s1199_s24] sm:$0xf]  ;;  %vm328_vm1 = vcmask 130048   ;;  %vm333_vm2 = vcmask 7168   ;;  %s1346_s10 = sld [smem:[#allocation17_spill]] }
  0x70   : > { %318 = vmatpush.bf16.xpose.msra.mxu0 %v549_v1 }
  0x75   : > { %v324_v9 = vld [vmem:[#allocation2] sm:$0xff]  ;;  %p541_p11 = scmp.ne.s32.totalorder %s1346_s10, 1 }
  0x76   : > { %s1347_s5 = sld [smem:[#allocation18_spill]] (!%p541_p11) }
  0x77   : > { %319 = vmatmul.bf16.vlgmr.msra.gmra.mxu0 %v302_v2 }
  0x7c   : > { %s543_s12 = sshll.u32 (!%p541_p11), %s1347_s5, 3 }
  0xf4   : > { %v320_v3 = vpop.f32.mrf.mxu0 }
  0xf5   : > { %v540_v4 = vadd.f32 -2.0, %v320_v3 }
  0xf7   : > { %v326_v5 = vmul.f32 1.442695, %v540_v4 }
  0xf9   : > { %690 = vpow2.f32 %v326_v5 }
  0xfc   : > { %v322_v6 = vpop.f32.mrf.mxu0 }
  0xff   : > { %v691_v7 = vpop.eup %690 }
 0x100   : > { %v329_v8 = vsel %vm328_vm1, %v691_v7, 0.0 }
 0x101   : > { %330 = vadd.xlane.f32.xlu0 %v329_v8 }
 0x173   : > { %338 = sbr.rel (%p541_p11) target bundleno = 642 (0x282), region = 52 }
 0x174   : > { %v331_v10 = vpop.xlane.xlu0 %330 }
 0x175   : > { %v332_v11 = vadd.f32 %v331_v10, %v324_v9 }
 0x177   : > { %334 = vst.msk [vmem:[#allocation2] sm:$0xff] %vm333_vm2, %v332_v11 }
 0x178   : > { %v339_v12 = vld [vmem:[%s1199_s24] sm:$0xf]  ;;  %v341_v14 = vld [vmem:[%s246_s4] sm:$0xf]  ;;  %v947_v18 = vmov 0   ;;  %v359_v22 = vlaneseq  ;;  %v361_v27 = vstv %s543_s12 }
 0x179   : > { %v340_v13 = vunpack.c.l.bf16 %v339_v12  ;;  %v342_v16 = vunpack.c.l.bf16 %v341_v14  ;;  %692 = vset.pattern.permute.xlu1 %v947_v18  ;;  %693 = vset.pattern.permute.xlu0 %v947_v18 }
 0x17a   : > { %v360_v26 = vshrl.u32 %v359_v22, 7 }
 0x17b   : > { %v346_v15 = vmul.f32 %v340_v13, %v340_v13  ;;  %v343_v17 = vmul.f32 %v342_v16, %v340_v13 }
 0x17c   : > { %v362_v29 = vadd.s32 %v361_v27, %v360_v26 }
 0x17d   : > { %347 = vadd.xlane.f32.xlu0 %v346_v15 }
 0x17e   : > { %v349_v23 = vld [vmem:[#allocation2] sm:$0xff]  ;;  %vm364_vm3 = vcmp.ge.s32.totalorder %v362_v29, 16  ;;  %vm365_vm4 = vcmp.lt.s32.totalorder %v362_v29, 32  ;;  %vm363_vm5 = vcmp.lt.s32.totalorder %v362_v29, 16 }
 0x17f   : > { %vm366_vm6 = vmand %vm364_vm3, %vm365_vm4 }
 0x180   : > { %vm367_vm7 = vmor %vm363_vm5, %vm366_vm6 }
 0x185   : > { %344 = vadd.xlane.f32.xlu0 %v343_v17 }
 0x1f0   : > { %v348_v19 = vpop.xlane.xlu0 %347 }
 0x1f1   : > { %v542_v20 = vadd.f32 -2.0, %v348_v19 }
 0x1f3   : > { %v351_v21 = vmul.f32 1.442695, %v542_v20 }
 0x1f5   : > { %694 = vpow2.f32 %v351_v21 }
 0x1f8   : > { %v345_v32 = vpop.xlane.xlu0 %344 }
 0x1fb   : > { %v695_v24 = vpop.eup %694 }
 0x1fc   : > { %v353_v25 = vsub.f32 %v349_v23, %v695_v24 }
 0x1fe   : > { %v354_v28 = vmax.f32 %v353_v25, 1e-30 }
 0x200   : > { %696 = vlog2.f32 %v354_v28 }
 0x206   : > { %v697_v30 = vpop.eup %696 }
 0x207   : > { %v356_v31 = vmul.f32 0.6931472, %v697_v30 }
 0x209   : > { %v357_v33 = vadd.f32 2.0, %v356_v31 }
 0x20b   : > { %v368_v34 = vsub.f32 %v357_v33, %v345_v32 }
 0x20d   : > { %v369_v35 = vsel %vm367_vm7, %v368_v34, 0.0 }
 0x20e   : > { %372 = vperm.xlu1 %692, %v369_v35  }
 0x280   : > { %v373_v36 = vpop.permute.xlu1 %372 }
 0x281   : > { %375 = vst [vmem:[%s1220_s8] sm:$0xff] %v373_v36 }
 0x282 PF: > { %s1348_s6 = sld [smem:[#allocation18_spill]]  ;;  %s389_s24 = sshll.u32 %s1220_s8, 4  ;;  %s390_s24 = int_to_ptr.vmem [resolvable:$true] %s389_s24 }
 0x283   : > { %s1350_s17 = sld [smem:[#allocation28_spill]]  ;;  %s377_s29 = scalar_lea.sflag [#allocation5], %s1195_s3 }
 0x288   : > { %s545_s22 = sshll.u32 %s1348_s6, 3 }
 0x289   : > { %s1351_s28 = smov %s1350_s17  ;;  %s387_s18 = scalar_lea.hbm %s1350_s17, %s545_s22 }
 0x28a   : > { %s391_s20 = sshll.u32 %s387_s18, 4  ;;  %s808_s15 = scalar_lea.hbm %s1351_s28, 32  ;;  %s392_s20 = int_to_ptr.hbm [resolvable:$true] %s391_s20 }
 0x28b   : > { %s802_s27 = sshra.s32 %s392_s20, 4  ;;  %s803_s27 = int_to_ptr.hbm [resolvable:$true] %s802_s27 }
 0x28c   : > { %s804_s4 = scalar_lea.hbm %s803_s27, 8  ;;  %p809_p12 = scmp.lt.s32.totalorder %s803_s27, %s1351_s28 }
 0x28d   : > { %p805_p4 = scmp.ne.s32.totalorder %s803_s27, %s804_s4  ;;  %p810_p0 = scmp.lt.s32.totalorder %s808_s15, %s804_s4 }
 0x28f   : > { %p806_p1 = pnand %p805_p4, %p1167_p9  ;;  %p811_p5 = por %p810_p0, %p809_p12 }
 0x291   : > { %p807_p10 = pneg %p806_p1 }
 0x293   : > { %p812_p8 = pnand %p811_p5, %p807_p10 }
 0x295   : > { %815 = shalt.err (!%p812_p8)
}
 0x296   : > { %556 = dma.vmem_to_hbm [thread:$0]  (%p1167_p9), %s390_s24, 128, %s392_s20, %s377_s29  }
 0x297 PF: > { %s1352_s3 = sld [smem:[#allocation15_spill]]  ;;  %p573_p13 = scmp.ge.s32.totalorder %s942_s25, 2 }
 0x299   : > { %p569_p3 = pnand %p573_p13, %p1173_p2 }
 0x29b   : > { %p570_p7 = pneg %p569_p3 }
 0x29d   : > { %s403_s10 = sand.u32 1, %s1352_s3  }
 0x29e   : > { %s404_s5 = scalar_lea.sflag [#allocation5], %s403_s10 }
 0x29f   : > { %885 = dma.done.wait (%p570_p7), %s404_s5, 128  }
 0x2a0   : > { %887 = vsyncadd (%p570_p7), %s404_s5, 4294967168  ;;  %s22_s25 = sadd.s32 1, %s942_s25   ;;  %s1355_s6 = sld [smem:[#allocation23_spill]] }
 0x2a1   : > { %p1251_p6 = scmp.ge.s32.totalorder %s22_s25, 10   ;;  %s1356_s1 = sld [smem:[#allocation14_spill]] }
 0x2a2   : > { %s1357_s17 = sld [smem:[#allocation22_spill]]  ;;  %s1364_s12 = smov %s894_s13 }
 0x2a3   : > { %s1358_s22 = sld [smem:[#allocation16_spill]]  ;;  %s1365_s13 = smov %s898_s14 }
 0x2a4   : > { %s1359_s20 = sld [smem:[#allocation24_spill]]  ;;  %s1367_s15 = smov %s906_s16 }
 0x2a5   : > { %s1360_s30 = sld [smem:[#allocation19_spill]]  ;;  %s1369_s18 = smov %s918_s19 }
 0x2a6   : > { %s1361_s9 = sld [smem:[#allocation20_spill]]  ;;  %s1366_s14 = smov %s1355_s6 }
 0x2a7   : > { %s1362_s24 = sld [smem:[#allocation21_spill]]  ;;  %s1368_s16 = smov %s1356_s1 }
 0x2a8   : > { %s1371_s21 = smov %s934_s23  ;;  %21 = sbr.rel (!%p1251_p6) target bundleno = 15 (0xf), region = 109 }
 0x2a9   : > { %s1370_s19 = smov %s1358_s22 }
 0x2ab   : > { %s1372_s22 = smov %s1360_s30 }
 0x2ac   : > { %s1373_s23 = smov %s1361_s9 }
 0x2ad   :  { %410 = vsyncpa [#allocation4], 1 }
 0x2ae   :  { %412 = vsyncpa [#allocation4 + $0x1], 1 }
 0x2af   :  { %413 = vsyncpa [#allocation7], 1 }
 0x2b0   :  { %415 = vsyncpa [#allocation7 + $0x1], 1 }
 0x2b1   :  { %416 = vsyncpa [#allocation5], 1 }
 0x2b2   :  { %418 = vsyncpa [#allocation5 + $0x1], 1 }

</bundles_post_ra>
